<compile_context>
chip_gen: v7x
topology: tpu7x:2x2x1
jax: 0.10.0
libtpu: 0.0.40
codegen_flags: <defaults>
</compile_context>

<pallas_src>
import functools

import jax
import jax.numpy as jnp
from jax.experimental import pallas as pl
from jax.experimental.pallas import tpu as pltpu


def _up_conv_kernel(xb_ref, xh0_ref, xh1_ref, w_ref, scale_ref, shift_ref,
                    o_ref, *, cin, cout, win, rp):
    """One strip of `rp` output row pairs of one batch element per grid step.

    xb_ref:    (1, rp, Cin, Wup)   body rows of padded, W-upsampled input (bf16)
    xh0_ref:   (1, 1,  Cin, Wup)   halo row rp of the strip
    xh1_ref:   (1, 1,  Cin, Wup)   halo row rp+1 of the strip
    w_ref:     (3*2*Cout, 3*Cin)   merged weights, rows=(kw, co, a), cols=(dh, ci)
    scale_ref: (2*Cout, 1)         folded BN scale, rows=(co, a)        (f32)
    shift_ref: (2*Cout, 1)         folded BN shift (incl. conv bias)    (f32)
    o_ref:     (1, Cout, 2*rp, 2*Win)  output strip, NCHW               (bf16)
    """
    wup = 2 * win + 2
    twow = 2 * win
    two_c = 2 * cout
    w = w_ref[...]                                     # resident weights

    # ---- build the RHS of ONE fused matmul for the whole strip ---------------
    # lane segment t holds the 3-row window (strip rows t..t+2), flattened as
    # (dh, ci) on the contraction axis.  Last two windows pull in the halo rows.
    cols = []
    for t in range(rp):
        if t + 3 <= rp:
            win3 = xb_ref[0, t:t + 3]                                   # (3,Cin,Wup)
        elif t + 2 == rp:
            win3 = jnp.concatenate([xb_ref[0, t:t + 2], xh0_ref[0]], axis=0)
        else:
            win3 = jnp.concatenate(
                [xb_ref[0, t:t + 1], xh0_ref[0], xh1_ref[0]], axis=0)
        cols.append(win3.reshape(3 * cin, wup))
    rhs = jnp.concatenate(cols, axis=-1)                      # (3*Cin, rp*Wup) bf16

    # ---- single MXU contraction for all row pairs / taps of the strip --------
    d = jnp.dot(w, rhs, preferred_element_type=jnp.float32)  # (6*Cout, rp*Wup) f32

    # ---- kw-combine via two global lane-shifted adds (the 2 junk lanes between
    #      segments are never read), then fused BN(eval)+bias+ReLU in f32 ------
    L = rp * wup
    acc = (d[0 * two_c:1 * two_c, 0:L - 2]
           + d[1 * two_c:2 * two_c, 1:L - 1]
           + d[2 * two_c:3 * two_c, 2:L])                     # (2*Cout, L-2)
    y = jnp.maximum(acc * scale_ref[...] + shift_ref[...], 0.0)

    # ---- assemble the NCHW strip and issue ONE full-tile store ---------------
    segs = [y[:, t * wup:t * wup + twow].reshape(cout, 2, twow) for t in range(rp)]
    o_ref[0] = jnp.concatenate(segs, axis=1).astype(o_ref.dtype)   # (Cout, 2rp, 2W)


def _pick_row_pairs(hin):
    """Output-strip height (in row pairs): keeps the out block sublane-aligned."""
    for rp in (8, 4):
        if hin % rp == 0:
            return rp
    return hin  # whole image as one strip (block == full dim, always legal)


def _vmem_limit_bytes():
    # Generation-aware scoped-VMEM limit: ~3/4 of physical, capped at 100 MiB
    # (v5e/v6e: 128 MiB physical; v7x: 64 MiB physical -> stays at 48 MiB).
    try:
        cap = pltpu.get_tpu_info().vmem_capacity_bytes
        return int(min(100 * 1024 * 1024, (cap * 3) // 4))
    except Exception:
        return 48 * 1024 * 1024


@jax.jit
def up_conv_forward(x_nchw, w_oihw, bias, gamma, beta, running_mean, running_var):
    """Forward pass of up_conv.  Input/output in NCHW (PyTorch convention)."""
    eps = 1e-5
    N, Cin, Hin, Win = x_nchw.shape
    Cout = w_oihw.shape[0]
    rp = _pick_row_pairs(Hin)
    Hp, Wup = Hin + 2, 2 * Win + 2

    # --- W-only nearest upsample + zero pad; (N, Hp, Cin, Wup) bf16 layout so
    #     each 3-row window flattens straight onto the (dh, ci) contraction axis.
    xw = jnp.repeat(x_nchw, 2, axis=3)                              # (N,Cin,Hin,2W)
    xp = jnp.pad(xw, ((0, 0), (0, 0), (1, 1), (1, 1)))
    xp = jnp.transpose(xp, (0, 2, 1, 3)).astype(jnp.bfloat16)       # (N,Hp,Cin,Wup)

    # --- fold the H upsample into merged conv weights --------------------------
    w_k = jnp.transpose(w_oihw, (2, 3, 1, 0)).astype(jnp.float32)   # (kh,kw,ci,co)
    a_i = jnp.arange(2)[:, None, None]
    d_i = jnp.arange(3)[None, :, None]
    k_i = jnp.arange(3)[None, None, :]
    amap = ((a_i + k_i + 1) // 2 == d_i).astype(jnp.float32)        # (a, dh, kh)
    wh = jnp.einsum('adk,kwcf->adwcf', amap, w_k)                   # (a,dh,kw,ci,co)
    # rows = (kw, co, a); cols = (dh, ci)
    wcat = jnp.transpose(wh, (2, 4, 0, 1, 3)).reshape(3 * 2 * Cout, 3 * Cin)
    wcat = wcat.astype(jnp.bfloat16)

    # --- fold BatchNorm (eval) + conv bias into per-(channel,parity) scale/shift
    scale = gamma / jnp.sqrt(running_var + eps)
    shift = beta + (bias - running_mean) * scale
    scale2 = jnp.repeat(scale, 2).reshape(2 * Cout, 1).astype(jnp.float32)
    shift2 = jnp.repeat(shift, 2).reshape(2 * Cout, 1).astype(jnp.float32)

    kernel = functools.partial(_up_conv_kernel, cin=Cin, cout=Cout, win=Win, rp=rp)
    out = pl.pallas_call(
        kernel,
        out_shape=jax.ShapeDtypeStruct((N, Cout, 2 * Hin, 2 * Win), jnp.bfloat16),
        grid=(N, Hin // rp),
        in_specs=[
            # halo'd H-strips of the padded input: body + two single-row halos
            pl.BlockSpec((1, rp, Cin, Wup), lambda n, h: (n, h, 0, 0)),
            pl.BlockSpec((1, 1, Cin, Wup), lambda n, h: (n, h * rp + rp, 0, 0)),
            pl.BlockSpec((1, 1, Cin, Wup), lambda n, h: (n, h * rp + rp + 1, 0, 0)),
            # resident merged weights / BN scale / BN shift
            pl.BlockSpec((3 * 2 * Cout, 3 * Cin), lambda n, h: (0, 0)),
            pl.BlockSpec((2 * Cout, 1), lambda n, h: (0, 0)),
            pl.BlockSpec((2 * Cout, 1), lambda n, h: (0, 0)),
        ],
        out_specs=pl.BlockSpec((1, Cout, 2 * rp, 2 * Win),
                               lambda n, h: (n, 0, h, 0)),
        compiler_params=pltpu.CompilerParams(
            dimension_semantics=("parallel", "parallel"),
            vmem_limit_bytes=_vmem_limit_bytes(),
        ),
        cost_estimate=pl.CostEstimate(
            flops=2 * N * (2 * Hin) * (2 * Win) * 9 * Cin * Cout,
            transcendentals=0,
            bytes_accessed=(N * (Hin + 2 * (Hin // rp)) * Cin * Wup * 2
                            + 3 * 2 * Cout * 3 * Cin * 2
                            + 2 * 2 * Cout * 4
                            + N * Cout * 4 * Hin * Win * 2),
        ),
    )(xp, xp, xp, wcat, scale2, shift2)
    return out


def _reference(x, w, bias, gamma, beta, mean, var):
    """Pure-JAX f32 reference (exact module semantics, eval-mode BN)."""
    eps = 1e-5
    xu = jnp.repeat(jnp.repeat(x, 2, axis=2), 2, axis=3)
    y = jax.lax.conv_general_dilated(
        xu, w, window_strides=(1, 1), padding=((1, 1), (1, 1)),
        dimension_numbers=("NCHW", "OIHW", "NCHW"),
        precision=jax.lax.Precision.HIGHEST,
    ) + bias.reshape(1, -1, 1, 1)
    y = (y - mean.reshape(1, -1, 1, 1)) / jnp.sqrt(var.reshape(1, -1, 1, 1) + eps)
    y = y * gamma.reshape(1, -1, 1, 1) + beta.reshape(1, -1, 1, 1)
    return jnp.maximum(y, 0.0)


if __name__ == "__main__":
    key = jax.random.PRNGKey(0)
    k_x, k_w, k_b, k_g, k_bt, k_m, k_v = jax.random.split(key, 7)

    N, ch_in, ch_out, Hin, Win = 2, 4, 8, 16, 16

    x = jax.random.normal(k_x, (N, ch_in, Hin, Win), dtype=jnp.float32)
    w = jax.random.normal(k_w, (ch_out, ch_in, 3, 3), dtype=jnp.float32) * 0.1
    bias = jax.random.normal(k_b, (ch_out,), dtype=jnp.float32) * 0.1
    gamma = 1.0 + 0.1 * jax.random.normal(k_g, (ch_out,), dtype=jnp.float32)
    beta = 0.1 * jax.random.normal(k_bt, (ch_out,), dtype=jnp.float32)
    running_mean = 0.1 * jax.random.normal(k_m, (ch_out,), dtype=jnp.float32)
    running_var = 0.5 + jnp.abs(jax.random.normal(k_v, (ch_out,), dtype=jnp.float32))

    out = up_conv_forward(x, w, bias, gamma, beta, running_mean, running_var)
    out = jax.block_until_ready(out)

    ref = _reference(x, w, bias, gamma, beta, running_mean, running_var)
    assert out.shape == (N, ch_out, 2 * Hin, 2 * Win), out.shape
    # bf16 activations/weights/output in the kernel -> expected O(1e-2) deviation
    # from the pure-f32 reference; any structural bug (wrong tap / parity / BN
    # fold / halo row) would be O(1).
    err = jnp.abs(out.astype(jnp.float32) - ref)
    max_err = float(jnp.max(err))
    assert jnp.allclose(out.astype(jnp.float32), ref, atol=5e-2, rtol=5e-2), max_err

    print("KERNEL_OK")
</pallas_src>

<mosaic_0001>
module attributes {stable_mosaic.version = 11 : i64} {
  func.func @_up_conv_kernel(%arg0: i32, %arg1: i32, %arg2: memref<1x8x4x34xbf16, #tpu.memory_space<vmem>>, %arg3: memref<1x1x4x34xbf16, #tpu.memory_space<vmem>>, %arg4: memref<1x1x4x34xbf16, #tpu.memory_space<vmem>>, %arg5: memref<48x12xbf16, #tpu.memory_space<vmem>>, %arg6: memref<16x1xf32, #tpu.memory_space<vmem>>, %arg7: memref<16x1xf32, #tpu.memory_space<vmem>>, %arg8: memref<1x8x16x32xbf16, #tpu.memory_space<vmem>>) attributes {dimension_semantics = [#tpu.dimension_semantics<parallel>, #tpu.dimension_semantics<parallel>], iteration_bounds = array<i64: 2, 2>, scalar_prefetch = 0 : i64, scratch_operands = 0 : i64, tpu.core_type = #tpu.core_type<tc>, window_params = [{transform_indices = @transform_0, window_bounds = array<i64: 1, 8, 4, 34>}, {transform_indices = @transform_1, window_bounds = array<i64: 1, 1, 4, 34>}, {transform_indices = @transform_2, window_bounds = array<i64: 1, 1, 4, 34>}, {pipeline_mode = #tpu.pipeline_mode<synchronous>, transform_indices = @transform_3, window_bounds = array<i64: 48, 12>}, {pipeline_mode = #tpu.pipeline_mode<synchronous>, transform_indices = @transform_4, window_bounds = array<i64: 16, 1>}, {pipeline_mode = #tpu.pipeline_mode<synchronous>, transform_indices = @transform_5, window_bounds = array<i64: 16, 1>}, {transform_indices = @transform_6, window_bounds = array<i64: 1, 8, 16, 32>}]} {
    %c0 = arith.constant 0 : index
    %c0_0 = arith.constant 0 : index
    %0 = vector.load %arg5[%c0, %c0_0] : memref<48x12xbf16, #tpu.memory_space<vmem>>, vector<48x12xbf16>
    %c0_1 = arith.constant 0 : index
    %c0_2 = arith.constant 0 : index
    %c0_3 = arith.constant 0 : index
    %c0_4 = arith.constant 0 : index
    %1 = vector.load %arg2[%c0_1, %c0_2, %c0_3, %c0_4] : memref<1x8x4x34xbf16, #tpu.memory_space<vmem>>, vector<1x3x4x34xbf16>
    %2 = vector.shape_cast %1 : vector<1x3x4x34xbf16> to vector<3x4x34xbf16>
    %3 = vector.shape_cast %2 : vector<3x4x34xbf16> to vector<12x34xbf16>
    %c0_5 = arith.constant 0 : index
    %c1 = arith.constant 1 : index
    %c0_6 = arith.constant 0 : index
    %c0_7 = arith.constant 0 : index
    %4 = vector.load %arg2[%c0_5, %c1, %c0_6, %c0_7] : memref<1x8x4x34xbf16, #tpu.memory_space<vmem>>, vector<1x3x4x34xbf16>
    %5 = vector.shape_cast %4 : vector<1x3x4x34xbf16> to vector<3x4x34xbf16>
    %6 = vector.shape_cast %5 : vector<3x4x34xbf16> to vector<12x34xbf16>
    %c0_8 = arith.constant 0 : index
    %c2 = arith.constant 2 : index
    %c0_9 = arith.constant 0 : index
    %c0_10 = arith.constant 0 : index
    %7 = vector.load %arg2[%c0_8, %c2, %c0_9, %c0_10] : memref<1x8x4x34xbf16, #tpu.memory_space<vmem>>, vector<1x3x4x34xbf16>
    %8 = vector.shape_cast %7 : vector<1x3x4x34xbf16> to vector<3x4x34xbf16>
    %9 = vector.shape_cast %8 : vector<3x4x34xbf16> to vector<12x34xbf16>
    %c0_11 = arith.constant 0 : index
    %c3 = arith.constant 3 : index
    %c0_12 = arith.constant 0 : index
    %c0_13 = arith.constant 0 : index
    %10 = vector.load %arg2[%c0_11, %c3, %c0_12, %c0_13] : memref<1x8x4x34xbf16, #tpu.memory_space<vmem>>, vector<1x3x4x34xbf16>
    %11 = vector.shape_cast %10 : vector<1x3x4x34xbf16> to vector<3x4x34xbf16>
    %12 = vector.shape_cast %11 : vector<3x4x34xbf16> to vector<12x34xbf16>
    %c0_14 = arith.constant 0 : index
    %c4 = arith.constant 4 : index
    %c0_15 = arith.constant 0 : index
    %c0_16 = arith.constant 0 : index
    %13 = vector.load %arg2[%c0_14, %c4, %c0_15, %c0_16] : memref<1x8x4x34xbf16, #tpu.memory_space<vmem>>, vector<1x3x4x34xbf16>
    %14 = vector.shape_cast %13 : vector<1x3x4x34xbf16> to vector<3x4x34xbf16>
    %15 = vector.shape_cast %14 : vector<3x4x34xbf16> to vector<12x34xbf16>
    %c0_17 = arith.constant 0 : index
    %c5 = arith.constant 5 : index
    %c0_18 = arith.constant 0 : index
    %c0_19 = arith.constant 0 : index
    %16 = vector.load %arg2[%c0_17, %c5, %c0_18, %c0_19] : memref<1x8x4x34xbf16, #tpu.memory_space<vmem>>, vector<1x3x4x34xbf16>
    %17 = vector.shape_cast %16 : vector<1x3x4x34xbf16> to vector<3x4x34xbf16>
    %18 = vector.shape_cast %17 : vector<3x4x34xbf16> to vector<12x34xbf16>
    %c0_20 = arith.constant 0 : index
    %c6 = arith.constant 6 : index
    %c0_21 = arith.constant 0 : index
    %c0_22 = arith.constant 0 : index
    %19 = vector.load %arg2[%c0_20, %c6, %c0_21, %c0_22] : memref<1x8x4x34xbf16, #tpu.memory_space<vmem>>, vector<1x2x4x34xbf16>
    %20 = vector.shape_cast %19 : vector<1x2x4x34xbf16> to vector<2x4x34xbf16>
    %c0_23 = arith.constant 0 : index
    %c0_24 = arith.constant 0 : index
    %c0_25 = arith.constant 0 : index
    %c0_26 = arith.constant 0 : index
    %21 = vector.load %arg3[%c0_23, %c0_24, %c0_25, %c0_26] : memref<1x1x4x34xbf16, #tpu.memory_space<vmem>>, vector<1x1x4x34xbf16>
    %22 = vector.shape_cast %21 : vector<1x1x4x34xbf16> to vector<1x4x34xbf16>
    %23 = tpu.concatenate %20, %22 in 0 : vector<2x4x34xbf16>, vector<1x4x34xbf16> -> vector<3x4x34xbf16>
    %24 = vector.shape_cast %23 : vector<3x4x34xbf16> to vector<12x34xbf16>
    %c0_27 = arith.constant 0 : index
    %c7 = arith.constant 7 : index
    %c0_28 = arith.constant 0 : index
    %c0_29 = arith.constant 0 : index
    %25 = vector.load %arg2[%c0_27, %c7, %c0_28, %c0_29] : memref<1x8x4x34xbf16, #tpu.memory_space<vmem>>, vector<1x1x4x34xbf16>
    %26 = vector.shape_cast %25 : vector<1x1x4x34xbf16> to vector<1x4x34xbf16>
    %c0_30 = arith.constant 0 : index
    %c0_31 = arith.constant 0 : index
    %c0_32 = arith.constant 0 : index
    %c0_33 = arith.constant 0 : index
    %27 = vector.load %arg3[%c0_30, %c0_31, %c0_32, %c0_33] : memref<1x1x4x34xbf16, #tpu.memory_space<vmem>>, vector<1x1x4x34xbf16>
    %28 = vector.shape_cast %27 : vector<1x1x4x34xbf16> to vector<1x4x34xbf16>
    %c0_34 = arith.constant 0 : index
    %c0_35 = arith.constant 0 : index
    %c0_36 = arith.constant 0 : index
    %c0_37 = arith.constant 0 : index
    %29 = vector.load %arg4[%c0_34, %c0_35, %c0_36, %c0_37] : memref<1x1x4x34xbf16, #tpu.memory_space<vmem>>, vector<1x1x4x34xbf16>
    %30 = vector.shape_cast %29 : vector<1x1x4x34xbf16> to vector<1x4x34xbf16>
    %31 = tpu.concatenate %26, %28, %30 in 0 : vector<1x4x34xbf16>, vector<1x4x34xbf16>, vector<1x4x34xbf16> -> vector<3x4x34xbf16>
    %32 = vector.shape_cast %31 : vector<3x4x34xbf16> to vector<12x34xbf16>
    %33 = tpu.concatenate %3, %6, %9, %12, %15, %18, %24, %32 in 1 : vector<12x34xbf16>, vector<12x34xbf16>, vector<12x34xbf16>, vector<12x34xbf16>, vector<12x34xbf16>, vector<12x34xbf16>, vector<12x34xbf16>, vector<12x34xbf16> -> vector<12x272xbf16>
    %cst = arith.constant dense<0.000000e+00> : vector<48x272xf32>
    %34 = tpu.matmul %0, %33, %cst {dimension_numbers = #tpu.dot_dimension_numbers<[1], [0], [0], [1], [0, 0, 1, 1], [], []>} : vector<48x12xbf16>, vector<12x272xbf16>, vector<48x272xf32> -> vector<48x272xf32>
    %35 = vector.extract_strided_slice %34 {offsets = [0, 0], sizes = [16, 270], strides = [1, 1]} : vector<48x272xf32> to vector<16x270xf32>
    %36 = vector.extract_strided_slice %34 {offsets = [16, 1], sizes = [16, 270], strides = [1, 1]} : vector<48x272xf32> to vector<16x270xf32>
    %37 = arith.addf %35, %36 : vector<16x270xf32>
    %38 = vector.extract_strided_slice %34 {offsets = [32, 2], sizes = [16, 270], strides = [1, 1]} : vector<48x272xf32> to vector<16x270xf32>
    %39 = arith.addf %37, %38 : vector<16x270xf32>
    %c0_38 = arith.constant 0 : index
    %c0_39 = arith.constant 0 : index
    %40 = vector.load %arg6[%c0_38, %c0_39] : memref<16x1xf32, #tpu.memory_space<vmem>>, vector<16x1xf32>
    %41 = vector.broadcast %40 : vector<16x1xf32> to vector<16x270xf32>
    %42 = arith.mulf %39, %41 : vector<16x270xf32>
    %c0_40 = arith.constant 0 : index
    %c0_41 = arith.constant 0 : index
    %43 = vector.load %arg7[%c0_40, %c0_41] : memref<16x1xf32, #tpu.memory_space<vmem>>, vector<16x1xf32>
    %44 = vector.broadcast %43 : vector<16x1xf32> to vector<16x270xf32>
    %45 = arith.addf %42, %44 : vector<16x270xf32>
    %cst_42 = arith.constant 0.000000e+00 : f32
    %46 = vector.broadcast %cst_42 : f32 to vector<16x270xf32>
    %47 = arith.maximumf %45, %46 : vector<16x270xf32>
    %48 = vector.extract_strided_slice %47 {offsets = [0, 0], sizes = [16, 32], strides = [1, 1]} : vector<16x270xf32> to vector<16x32xf32>
    %49 = vector.shape_cast %48 : vector<16x32xf32> to vector<8x2x32xf32>
    %50 = vector.extract_strided_slice %47 {offsets = [0, 34], sizes = [16, 32], strides = [1, 1]} : vector<16x270xf32> to vector<16x32xf32>
    %51 = vector.shape_cast %50 : vector<16x32xf32> to vector<8x2x32xf32>
    %52 = vector.extract_strided_slice %47 {offsets = [0, 68], sizes = [16, 32], strides = [1, 1]} : vector<16x270xf32> to vector<16x32xf32>
    %53 = vector.shape_cast %52 : vector<16x32xf32> to vector<8x2x32xf32>
    %54 = vector.extract_strided_slice %47 {offsets = [0, 102], sizes = [16, 32], strides = [1, 1]} : vector<16x270xf32> to vector<16x32xf32>
    %55 = vector.shape_cast %54 : vector<16x32xf32> to vector<8x2x32xf32>
    %56 = vector.extract_strided_slice %47 {offsets = [0, 136], sizes = [16, 32], strides = [1, 1]} : vector<16x270xf32> to vector<16x32xf32>
    %57 = vector.shape_cast %56 : vector<16x32xf32> to vector<8x2x32xf32>
    %58 = vector.extract_strided_slice %47 {offsets = [0, 170], sizes = [16, 32], strides = [1, 1]} : vector<16x270xf32> to vector<16x32xf32>
    %59 = vector.shape_cast %58 : vector<16x32xf32> to vector<8x2x32xf32>
    %60 = vector.extract_strided_slice %47 {offsets = [0, 204], sizes = [16, 32], strides = [1, 1]} : vector<16x270xf32> to vector<16x32xf32>
    %61 = vector.shape_cast %60 : vector<16x32xf32> to vector<8x2x32xf32>
    %62 = vector.extract_strided_slice %47 {offsets = [0, 238], sizes = [16, 32], strides = [1, 1]} : vector<16x270xf32> to vector<16x32xf32>
    %63 = vector.shape_cast %62 : vector<16x32xf32> to vector<8x2x32xf32>
    %64 = tpu.concatenate %49, %51, %53, %55, %57, %59, %61, %63 in 1 : vector<8x2x32xf32>, vector<8x2x32xf32>, vector<8x2x32xf32>, vector<8x2x32xf32>, vector<8x2x32xf32>, vector<8x2x32xf32>, vector<8x2x32xf32>, vector<8x2x32xf32> -> vector<8x16x32xf32>
    %65 = arith.truncf %64 : vector<8x16x32xf32> to vector<8x16x32xbf16>
    %c0_43 = arith.constant 0 : index
    %c0_44 = arith.constant 0 : index
    %c0_45 = arith.constant 0 : index
    %c0_46 = arith.constant 0 : index
    %66 = vector.load %arg8[%c0_43, %c0_44, %c0_45, %c0_46] : memref<1x8x16x32xbf16, #tpu.memory_space<vmem>>, vector<1x8x16x32xbf16>
    %67 = vector.shape_cast %66 : vector<1x8x16x32xbf16> to vector<8x16x32xbf16>
    %68 = vector.shape_cast %65 : vector<8x16x32xbf16> to vector<1x8x16x32xbf16>
    tpu.vector_store %arg8[%c0_43, %c0_44, %c0_45, %c0_46], %68 {strides = array<i32>} : memref<1x8x16x32xbf16, #tpu.memory_space<vmem>>, vector<1x8x16x32xbf16>,
    return
  }
  func.func @transform_0(%arg0: i32, %arg1: i32) -> (i32, i32, i32, i32) {
    %c0_i32 = arith.constant 0 : i32
    %c0_i32_0 = arith.constant 0 : i32
    %c0_i32_1 = arith.constant 0 : i32
    return %arg0, %arg1, %c0_i32, %c0_i32_0 : i32, i32, i32, i32
  }
  func.func @transform_1(%arg0: i32, %arg1: i32) -> (i32, i32, i32, i32) {
    %c8_i32 = arith.constant 8 : i32
    %0 = arith.muli %arg1, %c8_i32 : i32
    %c8_i32_0 = arith.constant 8 : i32
    %1 = arith.addi %0, %c8_i32_0 : i32
    %c0_i32 = arith.constant 0 : i32
    %c0_i32_1 = arith.constant 0 : i32
    %c0_i32_2 = arith.constant 0 : i32
    return %arg0, %1, %c0_i32, %c0_i32_1 : i32, i32, i32, i32
  }
  func.func @transform_2(%arg0: i32, %arg1: i32) -> (i32, i32, i32, i32) {
    %c8_i32 = arith.constant 8 : i32
    %0 = arith.muli %arg1, %c8_i32 : i32
    %c8_i32_0 = arith.constant 8 : i32
    %1 = arith.addi %0, %c8_i32_0 : i32
    %c1_i32 = arith.constant 1 : i32
    %2 = arith.addi %1, %c1_i32 : i32
    %c0_i32 = arith.constant 0 : i32
    %c0_i32_1 = arith.constant 0 : i32
    %c0_i32_2 = arith.constant 0 : i32
    return %arg0, %2, %c0_i32, %c0_i32_1 : i32, i32, i32, i32
  }
  func.func @transform_3(%arg0: i32, %arg1: i32) -> (i32, i32) {
    %c0_i32 = arith.constant 0 : i32
    %c0_i32_0 = arith.constant 0 : i32
    %c0_i32_1 = arith.constant 0 : i32
    return %c0_i32, %c0_i32_0 : i32, i32
  }
  func.func @transform_4(%arg0: i32, %arg1: i32) -> (i32, i32) {
    %c0_i32 = arith.constant 0 : i32
    %c0_i32_0 = arith.constant 0 : i32
    %c0_i32_1 = arith.constant 0 : i32
    return %c0_i32, %c0_i32_0 : i32, i32
  }
  func.func @transform_5(%arg0: i32, %arg1: i32) -> (i32, i32) {
    %c0_i32 = arith.constant 0 : i32
    %c0_i32_0 = arith.constant 0 : i32
    %c0_i32_1 = arith.constant 0 : i32
    return %c0_i32, %c0_i32_0 : i32, i32
  }
  func.func @transform_6(%arg0: i32, %arg1: i32) -> (i32, i32, i32, i32) {
    %c0_i32 = arith.constant 0 : i32
    %c0_i32_0 = arith.constant 0 : i32
    %c0_i32_1 = arith.constant 0 : i32
    return %arg0, %c0_i32, %arg1, %c0_i32_0 : i32, i32, i32, i32
  }
}

</mosaic_0001>

<bundles_post_ra>
// kernel: up_conv_forward.1
= control target key start
LH: loop header
LB: loop body
LE: loop exit
PB: predicated region body
PF: predicated region fallthrough
CT: control target
= control target key end

     0   :  { %s3128_s0 = inlined_call_operand.vmem [shape: bf16[2,18,4,34], index: 0, kind: input, shape index: {}, may-alias: {0,1,2}]   ;;  %s3129_s1 = inlined_call_operand.vmem [shape: bf16[2,18,4,34], index: 1, kind: input, shape index: {}, may-alias: {0,1,2}]   ;;  %s3130_s2 = inlined_call_operand.vmem [shape: bf16[2,18,4,34], index: 2, kind: input, shape index: {}, may-alias: {0,1,2}]   ;;  %s3131_s3 = inlined_call_operand.vmem [shape: bf16[48,12], index: 3, kind: input, shape index: {}]   ;;  %s3132_s4 = inlined_call_operand.vmem [shape: f32[16,1], index: 4, kind: input, shape index: {}]   ;;  %s3133_s5 = inlined_call_operand.vmem [shape: f32[16,1], index: 5, kind: input, shape index: {}]   ;;  %s3134_s6 = inlined_call_operand.hbm [shape: bf16[2,8,32,32], index: 6, kind: output, shape index: {}]  }
   0x1   :  { %3135 = sst [smem:[#allocation7_spill]] %s3128_s0 }
   0x2   :  { %3136 = sst [smem:[#allocation8_spill]] %s3129_s1 }
   0x3   :  { %11 = vsyncpa [#allocation3], 0 }
   0x4   :  { %13 = vsyncpa [#allocation3 + $0x1], 0  ;;  %s2488_s21 = smov 0   ;;  %s2490_s22 = smov 0  }
   0x5   :  { %s2492_s23 = smov 0   ;;  %s2494_s24 = smov 0  }
   0x6   :  { %s2496_s25 = smov 0   ;;  %s2498_s26 = smov 0  }
   0x7   :  { %s2500_s27 = smov 0   ;;  %s2502_s28 = smov 0  }
   0x8 LB: > { %s1945_s29 = sadd.s32 4294967295, %s2424_s28   ;;  %s1946_s30 = sadd.s32 4294967294, %s2424_s28   ;;  %s2424_s28 = sphi %s2502_s28, %s19_s28   ;;  %s2420_s27 = sphi %s2500_s27, %s3148_s27   ;;  %s2416_s26 = sphi %s2498_s26, %s3147_s26   ;;  %s2412_s25 = sphi %s2496_s25, %s3146_s25   ;;  %s2408_s24 = sphi %s2494_s24, %s3145_s24   ;;  %s2404_s23 = sphi %s2492_s23, %s3144_s23   ;;  %s2400_s22 = sphi %s2490_s22, %s3143_s22   ;;  %s2396_s21 = sphi %s2488_s21, %s3142_s21  }
   0x9   : > { %s28_s7 = sadd.s32 1, %s2416_s26  ;;  %s31_s8 = sadd.s32 1, %s2420_s27 }
   0xa   : > { %p29_p0 = scmp.ge.s32.totalorder %s28_s7, 2  ;;  %p205_p1 = scmp.ne.s32.totalorder %s2404_s23, %s2400_s22 }
   0xb   : > { %p206_p2 = scmp.eq.s32.totalorder %s1945_s29, 3  ;;  %p211_p5 = scmp.ne.s32.totalorder %s2400_s22, %s2396_s21 }
   0xc   : > { %s3150_s7 = smov (%p29_p0, %s28_s7), 0  ;;  %s3152_s8 = smov (!%p29_p0, %s31_s8), %s2420_s27 }
   0xd   : > { %s191_s9 = ssub.s32 %s2416_s26, %s3150_s7  ;;  %p2539_p3 = por %p206_p2, %p205_p1 }
   0xe   : > { %p33_p4 = scmp.ge.s32.totalorder %s3152_s8, 2  ;;  %p212_p6 = scmp.eq.s32.totalorder %s1946_s30, 3 }
   0xf   : > { %p1953_p7 = scmp.ge.s32.totalorder %s2424_s28, 1  ;;  %p290_p9 = scmp.lt.s32.totalorder %s2424_s28, 5 }
  0x10   : > { %s3154_s8 = smov (%p33_p4, %s3152_s8), 0  ;;  %p2548_p8 = por %p212_p6, %p211_p5 }
  0x11   : > { %s190_s12 = ssub.s32 %s2420_s27, %s3154_s8  ;;  %s195_s13 = sadd.s32 1, %s2404_s23 }
  0x12   : > { %s192_s14 = sor.u32 %s191_s9, %s190_s12  ;;  %p291_p10 = pnand %p1953_p7, %p290_p9 }
  0x13   : > { %p193_p11 = scmp.eq.s32.totalorder %s192_s14, 0  ;;  %s2560_s16 = sshll.u32 (!%p291_p10), %s2408_s24, 3  ;;  %v435_v0 = vlaneseq (!%p291_p10)  ;;  %v2426_v1 = vmov (!%p291_p10), 1983009808   ;;  %v2429_v39 = vmov (!%p291_p10), 0.0   ;;  %vm2432_vm0 = vmmov (!%p291_p10), 0  }
  0x14   : > { %294 = sbr.rel (%p291_p10) target bundleno = 756 (0x2f4), region = 44  ;;  %p353_p12 = scmp.lt.s32.totalorder (!%p291_p10), %s2412_s25, 1  ;;  %v433_v2 = vunpack.c.l.s4 (!%p291_p10), %v2426_v1  ;;  %2054 = vmatprep.subr.bf16.mxu1 (!%p291_p10), %v2429_v39  ;;  %2056 = vmatprep.mubr.msk.bf16.mxu1 (!%p291_p10), %vm2432_vm0, %v2429_v39  ;;  %v2433_v45 = vmov (!%p291_p10), 0   ;;  %v837_v50 = vld [vmem:[%s3132_s4] sm:$0xff] (!%p291_p10)  ;;  %vm593_vm1 = vcmask (!%p291_p10), 277504   ;;  %vm603_vm2 = vcmask (!%p291_p10), 64512  }
  0x15   : > { %s2557_s15 = scalar_select %p193_p11, %s2404_s23, %s195_s13  }
  0x16   : > { %p355_p13 = scmp.lt.s32.totalorder (!%p291_p10), %s2560_s16, 17  ;;  %v434_v3 = vunpack.c.0.s8 (!%p291_p10), %v433_v2  ;;  %v436_v4 = vshrl.u32 (!%p291_p10), %v435_v0, 7  ;;  %s367_s30 = sadd.s32 (!%p291_p10), 8, %s2560_s16  ;;  %679 = vmatprep.mubr.bf16.mxu0 (!%p291_p10), %v2433_v45  ;;  %2173 = vset.pattern.permute.xlu1 (!%p291_p10), %v2433_v45  ;;  %vm597_vm3 = vcmask (!%p291_p10), 556032   ;;  %vm606_vm4 = vcmask (!%p291_p10), 343040  }
  0x17   : > { %s3139_s0 = sld [smem:[#allocation7_spill]] (!%p291_p10)  ;;  %p2581_p0 = scmp.lt.s32.totalorder (!%p291_p10), %s367_s30, 17  ;;  %2174 = vset.pattern.permute.xlu0 (!%p291_p10), %v2433_v45  ;;  %vm600_vm5 = vcmask (!%p291_p10), 834560   ;;  %vm609_vm6 = vcmask (!%p291_p10), 621568   ;;  %vm612_vm7 = vcmask (!%p291_p10), 900096   ;;  %vm640_vm8 = vcmask (!%p291_p10), 1045504  }
  0x18   : > { %v2575_v5 = vsub.s32 (!%p291_p10), %v434_v3, %v436_v4  ;;  %s3141_s1 = sld [smem:[#allocation8_spill]] (!%p291_p10)  ;;  %vm630_vm9 = vcmask (!%p291_p10), 97280   ;;  %vm785_vm10 = vcmask (!%p291_p10), 1039360   ;;  %vm820_vm11 = vcmask (!%p291_p10), 1031168   ;;  %s2440_s12 = smov (!%p291_p10), 120  }
  0x19   : > { %s2441_s14 = smov (!%p291_p10), 86   ;;  %vm1651_vm12 = vcmask (!%p291_p10), 1041408   ;;  %vm1660_vm13 = vcmask (!%p291_p10), 1043456   ;;  %vm1313_vm14 = vcmask (!%p291_p10), 211968   ;;  %vm1765_vm15 = vcmask (!%p291_p10), 257024  }
  0x1b   : > { %s354_s17 = scalar_select %p353_p12, %s2412_s25, 1 }
  0x1c   : > { %s356_s18 = scalar_select %p355_p13, %s2560_s16, 17 }
  0x1d   : > { %s2566_s19 = smul.u32 18, %s354_s17  ;;  %s3156_s30 = smov (!%p2581_p0, %s367_s30), 17 }
  0x1e   : > { %s2427_s17 = smov 102  }
  0x1f   : > { %s358_s20 = sadd.s32 %s2566_s19, %s356_s18  ;;  %s379_s18 = sadd.s32 9, %s2560_s16 }
  0x20   : > { %s1956_s29 = sshll.u32 %s358_s20, 1  ;;  %s2428_s20 = smov 34  }
  0x21   : > { %s2573_s13 = scalar_lea.vmem %s3139_s0, %s1956_s29  ;;  %s373_s29 = sadd.s32 %s2566_s19, %s3156_s30 }
  0x22   : > { %v1967_v6 = vld [vmem:[%s2573_s13 + $0x6] sm:$0x3]  ;;  %v1968_v7 = vld [vmem:[%s2573_s13 + $0x8] sm:$0x3]  ;;  %v1961_v8 = vld [vmem:[%s2573_s13 + $0x2] sm:$0x3] }
  0x23   : > { %v492_v9 = vcombine.low %v1967_v6, %v1968_v7  ;;  %v1962_v10 = vld [vmem:[%s2573_s13 + $0x4] sm:$0x3]  ;;  %v1982_v11 = vld.sshfl [vmem:[%s2573_s13 + $0xa] sm:$0x3 pattern:$0x76325410] }
  0x24   : > { %v450_v12 = vcombine.low %v1961_v8, %v1962_v10  ;;  %v1970_v13 = vld [vmem:[%s2573_s13 + $0x8] sm:$0x3]  ;;  %v1980_v15 = vld.sshfl [vmem:[%s2573_s13 + $0x6] sm:$0x3 pattern:$0x76325410] }
  0x25   : > { %v499_v14 = vrot.slane %v492_v9, %v2575_v5  ;;  %v1971_v16 = vld [vmem:[%s2573_s13 + $0xa] sm:$0x3]  ;;  %v1974_v20 = vld [vmem:[%s2573_s13 + $0xc] sm:$0x3]  ;;  %v1964_v21 = vld [vmem:[%s2573_s13 + $0x4] sm:$0x3] }
  0x26   : > { %v457_v17 = vrot.slane %v450_v12, %v2575_v5  ;;  %v513_v18 = vcombine.low %v1970_v13, %v1971_v16  ;;  %v1973_v19 = vld [vmem:[%s2573_s13 + $0xa] sm:$0x3]  ;;  %v1983_v23 = vld.sshfl [vmem:[%s2573_s13 + $0xc] sm:$0x3 pattern:$0x76325410] }
  0x27   : > { %v507_v22 = vcombine.low %v499_v14, %v1982_v11  ;;  %v534_v24 = vcombine.low %v1973_v19, %v1974_v20  ;;  %v1965_v25 = vld [vmem:[%s2573_s13 + $0x6] sm:$0x3]  ;;  %v1984_v28 = vld.sshfl [vmem:[%s2573_s13 + $0xe] sm:$0x3 pattern:$0x76325410] }
  0x28   : > { %v465_v26 = vcombine.low %v457_v17, %v1980_v15  ;;  %v520_v27 = vrot.slane %v513_v18, %v2575_v5  ;;  %v471_v29 = vcombine.low %v1964_v21, %v1965_v25  ;;  %v1976_v31 = vld [vmem:[%s2573_s13 + $0xc] sm:$0x3]  ;;  %v1977_v32 = vld [vmem:[%s2573_s13 + $0xe] sm:$0x3]  ;;  %p382_p1 = scmp.lt.s32.totalorder %s379_s18, 17  ;;  %s1958_s9 = sshll.u32 %s373_s29, 1 }
  0x29   : > { %508 = vrot.lane.b32.xlu0 %v507_v22, %s2427_s17  ;;  %v541_v30 = vrot.slane %v534_v24, %v2575_v5  ;;  %v1981_v34 = vld.sshfl [vmem:[%s2573_s13 + $0x8] sm:$0x3 pattern:$0x76325410]  ;;  %v555_v36 = vcombine.low %v1976_v31, %v1977_v32  ;;  %v1978_v38 = vld [vmem:[%s2573_s13 + $0xe] sm:$0x3]  ;;  %s375_s16 = scalar_lea.vmem %s3141_s1, %s1958_s9 }
  0x2a   : > { %466 = vrot.lane.b32.xlu1 %v465_v26, %s2428_s20  ;;  %v528_v33 = vcombine.low %v520_v27, %v1983_v23  ;;  %v478_v35 = vrot.slane %v471_v29, %v2575_v5  ;;  %s2430_s17 = smov 8   ;;  %v424_v42 = vld [vmem:[%s375_s16] sm:$0x3]  ;;  %s3158_s18 = smov (!%p382_p1, %s379_s18), 17  ;;  %v399_v52 = vld [vmem:[%s2573_s13 + $0x2] sm:$0x3] }
  0x2b   : > { %v549_v37 = vcombine.low %v541_v30, %v1984_v28  ;;  %v562_v40 = vrot.slane %v555_v36, %v2575_v5  ;;  %s2431_s30 = smov 42   ;;  %v569_v43 = vrot.slane %v424_v42, %v2575_v5  ;;  %v575_v44 = vcombine.low %v1978_v38, %v424_v42  ;;  %s385_s20 = sadd.s32 %s2566_s19, %s3158_s18  ;;  %v398_v51 = vld [vmem:[%s2573_s13] sm:$0x3]  ;;  %v2356_v11 = vld [vmem:[%s3131_s3 + $0x8] sm:$0xff]   ;;  %v2357_v12 = vld [vmem:[%s3131_s3 + $0x10] sm:$0xff]  }
  0x2c   : > { %v486_v41 = vcombine.low %v478_v35, %v1981_v34  ;;  %s1960_s29 = sshll.u32 %s385_s20, 1  ;;  %s2434_s9 = smov 68   ;;  %v431_v53 = vcombine.low %v398_v51, %v399_v52  ;;  %v1979_v55 = vld.sshfl [vmem:[%s2573_s13 + $0x4] sm:$0x3 pattern:$0x76325410] }
  0x2d   : > { %529 = vrot.lane.b32.xlu0 %v528_v33, %s2430_s17  ;;  %v570_v46 = vcombine.low %v562_v40, %v569_v43  ;;  %v582_v47 = vrot.slane %v575_v44, %v2575_v5  ;;  %s387_s16 = scalar_lea.vmem %s3130_s2, %s1960_s29  ;;  %s2435_s17 = smov 76   ;;  %v2355_v9 = vld [vmem:[%s3131_s3] sm:$0xff]   ;;  %v838_v38 = vld [vmem:[%s3132_s4 + $0x8] sm:$0xff] }
  0x2e   : > { %550 = vrot.lane.b32.xlu1 %v549_v37, %s2431_s30  ;;  %v1985_v48 = vld.sshfl [vmem:[%s387_s16] sm:$0x3 pattern:$0x76325410]  ;;  %s2436_s19 = smov 110   ;;  %v438_v54 = vrot.slane %v431_v53, %v2575_v5  ;;  %s2437_s16 = smov 127  }
  0x2f   : > { %v590_v49 = vcombine.low %v582_v47, %v1985_v48  ;;  %v855_v37 = vld [vmem:[%s3133_s5] sm:$0xff]  ;;  %s2444_s18 = smov 52   ;;  %s2445_s30 = smov 18  }
  0x30   : > { %v446_v58 = vcombine.low %v438_v54, %v1979_v55 }
  0x31   : > { %487 = vrot.lane.b32.xlu0 %v486_v41, %s2434_s9  ;;  %s2439_s9 = smov 94  }
  0x32   : > { %571 = vrot.lane.b32.xlu1 %v570_v46, %s2435_s17  ;;  %s2438_s17 = smov 126  }
  0x35   : > { %591 = vrot.lane.b32.xlu0 %v590_v49, %s2436_s19  ;;  %s2443_s19 = smov 26  }
  0x36   : > { %841 = vperm.xlu1 %2173, %v837_v50  }
  0x9b   : > { %v509_v56 = vpop.permute.xlu0 %508 }
  0x9c   : > { %v467_v57 = vpop.permute.xlu1 %466 }
  0x9d   : > { %v596_v61 = vsel %vm593_vm1, %v446_v58, %v467_v57 }
  0x9f   : > { %v530_v59 = vpop.permute.xlu0 %529 }
  0xa0   : > { %v551_v60 = vpop.permute.xlu1 %550  ;;  %v605_v62 = vsel %vm603_vm2, %v509_v56, %v530_v59 }
  0xa1   : > { %v608_v2 = vsel %vm606_vm4, %v605_v62, %v551_v60 }
  0xa3   : > { %v488_v63 = vpop.permute.xlu0 %487 }
  0xa4   : > { %v599_v0 = vsel %vm597_vm3, %v596_v61, %v488_v63  ;;  %v572_v1 = vpop.permute.xlu1 %571 }
  0xa5   : > { %v602_v3 = vsel %vm600_vm5, %v599_v0, %v509_v56  ;;  %v611_v4 = vsel %vm609_vm6, %v608_v2, %v572_v1 }
  0xa6   : > { %v641_v10 = vsel %vm640_vm8, %v602_v3, 0 }
  0xa7   : > { %v592_v6 = vpop.permute.xlu0 %591 }
  0xa8   : > { %v614_v7 = vsel %vm612_vm7, %v611_v4, %v592_v6  ;;  %v645_v8 = vsel %vm640_vm8, %v592_v6, 0 }
  0xa9   : > { %1989 = vmatprep.subr.msk.bf16.mxu0 %vm640_vm8, %v614_v7  ;;  %2055 = vmatpush3.bf16.msra.mxu1 %v645_v8 }
  0xaa   : > { %648 = vmatpush1.bf16.msra.mxu0 %v641_v10 }
  0xac   : > { %2057 = vmatmul.mubr.msk.bf16.vlgmr.msra.gmra.mrb[0].mxu1 %vm630_vm9, %v2355_v9 }
  0xad   : > { %1990 = vmatmul.mubr.msk.bf16.vlgmr.msra.gmra.mrb[0].mxu0 %vm630_vm9, %v2355_v9  ;;  %2060 = vmatprep.mubr.msk.bf16.mxu1 %vm2432_vm0, %v2429_v39 }
  0xae   : > { %689 = vmatprep.mubr.bf16.mxu0 %v2433_v45 }
  0xb4   : > { %2061 = vmatmul.mubr.msk.bf16.gmra.mrb[4].mxu1 %vm630_vm9, %v2356_v11 }
  0xb5   : > { %1991 = vmatmul.mubr.msk.bf16.gmra.mrb[4].mxu0 %vm630_vm9, %v2356_v11  ;;  %2064 = vmatprep.mubr.msk.bf16.mxu1 %vm2432_vm0, %v2429_v39  ;;  %v856_v39 = vld [vmem:[%s3133_s5 + $0x8] sm:$0xff]  ;;  %v842_v40 = vpop.permute.xlu1 %841  ;;  %vm1634_vm0 = vcmask 146432  }
  0xb6   : > { %699 = vmatprep.mubr.bf16.mxu0 %v2433_v45 }
  0xbc   : > { %2065 = vmatmul.mubr.msk.bf16.gmra.mrb[8].mxu1 %vm630_vm9, %v2357_v12 }
  0xbd   : > { %1992 = vmatmul.mubr.msk.bf16.gmra.mrb[8].mxu0 %vm630_vm9, %v2357_v12 }
 0x17f   : > { %v2644_v13 = vpop.f32.mrb[0].mxu1 }
 0x180   : > { %v2646_v14 = vpop.f32.mrb[0].mxu0  ;;  %v2058_v15 = vpop.f32.mrb[1].mxu1 }
 0x181   : > { %v683_v16 = vpop.f32.mrb[1].mxu0  ;;  %v747_v17 = vpop.f32.mrb[2].mxu1 }
 0x182   : > { %v2648_v18 = vpop.f32.mrb[2].mxu0  ;;  %v2059_v19 = vpop.f32.mrb[3].mxu1 }
 0x183   : > { %v2650_v20 = vpop.f32.mrb[3].mxu0 }
 0x187   : > { %v752_v21 = vpop.f32.mrb[4].mxu1 }
 0x188   : > { %v2062_v22 = vpop.f32.mrb[5].mxu1  ;;  %777 = vrot.lane.b32.xlu1 %v752_v21, %s2437_s16  ;;  %v691_v23 = vpop.f32.mrb[4].mxu0 }
 0x189   : > { %v693_v24 = vpop.f32.mrb[5].mxu0  ;;  %v755_v25 = vpop.f32.mrb[6].mxu1 }
 0x18a   : > { %783 = vrot.lane.b32.xlu0 %v755_v25, %s2437_s16  ;;  %v695_v26 = vpop.f32.mrb[6].mxu0  ;;  %v2063_v27 = vpop.f32.mrb[7].mxu1 }
 0x18b   : > { %v697_v28 = vpop.f32.mrb[7].mxu0 }
 0x18c   : > { %773 = vrot.lane.b32.xlu1 %v691_v23, %s2437_s16 }
 0x18e   : > { %775 = vrot.lane.b32.xlu0 %v693_v24, %s2437_s16 }
 0x18f   : > { %v760_v29 = vpop.f32.mrb[8].mxu1 }
 0x190   : > { %781 = vrot.lane.b32.xlu1 %v697_v28, %s2437_s16  ;;  %v2066_v30 = vpop.f32.mrb[9].mxu1  ;;  %v701_v31 = vpop.f32.mrb[8].mxu0 }
 0x191   : > { %v763_v32 = vpop.f32.mrb[10].mxu1  ;;  %v703_v33 = vpop.f32.mrb[9].mxu0 }
 0x192   : > { %779 = vrot.lane.b32.xlu0 %v695_v26, %s2437_s16  ;;  %v2067_v34 = vpop.f32.mrb[11].mxu1  ;;  %v705_v35 = vpop.f32.mrb[10].mxu0  ;;  %s345_s16 = sand.u32 1, %s2400_s22  }
 0x193   : > { %v707_v36 = vpop.f32.mrb[11].mxu0  ;;  %s1954_s13 = sshll.u32 %s345_s16, 6  ;;  %s1783_s29 = scalar_lea.sflag [#allocation3], %s345_s16 }
 0x194   : > { %812 = vrot.lane.b32.xlu1 %v760_v29, %s2438_s17  ;;  %s2942_s20 = scalar_lea.vmem [#allocation2], %s1954_s13 }
 0x196   : > { %818 = vrot.lane.b32.xlu0 %v763_v32, %s2438_s17 }
 0x198   : > { %808 = vrot.lane.b32.xlu1 %v701_v31, %s2438_s17 }
 0x19a   : > { %810 = vrot.lane.b32.xlu0 %v703_v33, %s2438_s17 }
 0x19c   : > { %859 = vperm.xlu1 %2173, %v855_v37  }
 0x19e   : > { %814 = vrot.lane.b32.xlu0 %v705_v35, %s2438_s17 }
 0x1a0   : > { %816 = vrot.lane.b32.xlu1 %v707_v36, %s2438_s17  ;;  %s2442_s17 = smov 60  }
 0x1a2   : > { %846 = vperm.xlu0 %2174, %v838_v38  }
 0x1a4   : > { %864 = vperm.xlu1 %2173, %v856_v39  }
 0x1fa   : > { %v778_v41 = vpop.permute.xlu1 %777 }
 0x1fb   : > { %v798_v57 = vadd.f32 %v778_v41, %v2644_v13 }
 0x1fc   : > { %v784_v42 = vpop.permute.xlu0 %783 }
 0x1fd   : > { %v801_v43 = vadd.f32 %v784_v42, %v747_v17 }
 0x1fe   : > { %v774_v44 = vpop.permute.xlu1 %773 }
 0x200   : > { %v776_v45 = vpop.permute.xlu0 %775 }
 0x201   : > { %v786_v52 = vsel %vm785_vm10, %v774_v44, %v776_v45  ;;  %v787_v53 = vsel %vm785_vm10, %v776_v45, %v778_v41 }
 0x202   : > { %v782_v47 = vpop.permute.xlu1 %781  ;;  %v796_v58 = vadd.f32 %v786_v52, %v2646_v14  ;;  %v797_v59 = vadd.f32 %v787_v53, %v683_v16 }
 0x203   : > { %v789_v9 = vsel %vm785_vm10, %v782_v47, %v784_v42 }
 0x204   : > { %v780_v46 = vpop.permute.xlu0 %779  ;;  %v800_v21 = vadd.f32 %v789_v9, %v2650_v20 }
 0x205   : > { %v788_v3 = vsel %vm785_vm10, %v780_v46, %v782_v47 }
 0x206   : > { %v813_v50 = vpop.permute.xlu1 %812  ;;  %v799_v13 = vadd.f32 %v788_v3, %v2648_v18 }
 0x207   : > { %v833_v60 = vadd.f32 %v813_v50, %v798_v57 }
 0x208   : > { %v819_v48 = vpop.permute.xlu0 %818 }
 0x209   : > { %v836_v49 = vadd.f32 %v819_v48, %v801_v43  ;;  %v851_v63 = vmul.f32 %v842_v40, %v833_v60 }
 0x20a   : > { %v809_v54 = vpop.permute.xlu1 %808 }
 0x20c   : > { %v811_v51 = vpop.permute.xlu0 %810 }
 0x20d   : > { %v821_v55 = vsel %vm820_vm11, %v809_v54, %v811_v51  ;;  %v822_v56 = vsel %vm820_vm11, %v811_v51, %v813_v50 }
 0x20e   : > { %v831_v61 = vadd.f32 %v821_v55, %v796_v58  ;;  %v832_v62 = vadd.f32 %v822_v56, %v797_v59 }
 0x210   : > { %v849_v0 = vmul.f32 %v842_v40, %v831_v61  ;;  %v850_v1 = vmul.f32 %v842_v40, %v832_v62  ;;  %v815_v8 = vpop.permute.xlu0 %814 }
 0x21b   : > { %v860_v2 = vpop.permute.xlu1 %859 }
 0x21c   : > { %v867_v4 = vadd.f32 %v860_v2, %v849_v0  ;;  %v868_v6 = vadd.f32 %v860_v2, %v850_v1  ;;  %v869_v7 = vadd.f32 %v860_v2, %v851_v63 }
 0x21e   : > { %v2669_v10 = vmax.f32 %v867_v4, 0.0  ;;  %v2671_v11 = vmax.f32 %v868_v6, 0.0  ;;  %v875_v12 = vmax.f32 %v869_v7, 0.0 }
 0x21f   : > { %v817_v14 = vpop.permute.xlu1 %816 }
 0x220   : > { %v881_v15 = vcombine.high %v2669_v10, %v2669_v10  ;;  %v2678_v16 = vrot.slane %v2669_v10, %v2575_v5  ;;  %v2681_v17 = vcombine.low %v2671_v11, %v875_v12  ;;  %v2684_v19 = vcombine.high %v2671_v11, %v875_v12 }
 0x221   : > { %v823_v22 = vsel %vm820_vm11, %v815_v8, %v817_v14  ;;  %v824_v18 = vsel %vm820_vm11, %v817_v14, %v819_v48  ;;  %v847_v23 = vpop.permute.xlu0 %846  ;;  %v968_v24 = vrot.slane %v2671_v11, %v2575_v5  ;;  %v961_v27 = vcombine.high %v2671_v11, %v2671_v11 }
 0x222   : > { %v2692_v25 = vrot.slane %v881_v15, %v2575_v5  ;;  %v834_v26 = vadd.f32 %v823_v22, %v799_v13  ;;  %v835_v28 = vadd.f32 %v824_v18, %v800_v21  ;;  %v854_v29 = vmul.f32 %v847_v23, %v836_v49 }
 0x223   : > { %v865_v30 = vpop.permute.xlu1 %864  ;;  %v2698_v20 = vcombine.high %v2678_v16, %v2678_v16  ;;  %v1033_v31 = vcombine.low %v2678_v16, %v2678_v16  ;;  %v976_v35 = vcombine.high %v968_v24, %v968_v24  ;;  %v2719_v43 = vrot.slane %v968_v24, %v2575_v5 }
 0x224   : > { %v852_v32 = vmul.f32 %v847_v23, %v834_v26  ;;  %v2704_v33 = vcombine.high %v2692_v25, %v2692_v25  ;;  %v1056_v34 = vcombine.low %v2692_v25, %v2692_v25  ;;  %v853_v36 = vmul.f32 %v847_v23, %v835_v28 }
 0x225   : > { %v872_v37 = vadd.f32 %v865_v30, %v854_v29  ;;  %v1040_v38 = vrot.slane %v1033_v31, %v2575_v5  ;;  %v2711_v39 = vrot.slane %v2698_v20, %v2575_v5  ;;  %v2723_v47 = vrot.slane %v976_v35, %v2575_v5 }
 0x226   : > { %v870_v40 = vadd.f32 %v865_v30, %v852_v32  ;;  %v1063_v41 = vrot.slane %v1056_v34, %v2575_v5  ;;  %v2716_v42 = vrot.slane %v2704_v33, %v2575_v5  ;;  %v871_v44 = vadd.f32 %v865_v30, %v853_v36 }
 0x227   : > { %v878_v45 = vmax.f32 %v872_v37, 0.0  ;;  %v2175_v46 = vpack.i.bf16 %v2711_v39, %v1040_v38  ;;  %v975_v50 = vrot.slane %v961_v27, %v2575_v5  ;;  %v1410_v51 = vcombine.low %v968_v24, %v968_v24 }
 0x228   : > { %v2725_v48 = vmax.f32 %v870_v40, 0.0  ;;  %v2190_v49 = vpack.i.bf16 %v2716_v42, %v1063_v41  ;;  %v2729_v52 = vmax.f32 %v871_v44, 0.0  ;;  %v2180_v53 = vpack.i.bf16 %v2723_v47, %v2719_v43 }
 0x229   : > { %2176 = vrot.lane.b32.xlu0 %v2175_v46, %s2439_s9  ;;  %v977_v56 = vcombine.high %v975_v50, %v975_v50  ;;  %v2742_v57 = vrot.slane %v975_v50, %v2575_v5  ;;  %v1417_v60 = vrot.slane %v1410_v51, %v2575_v5  ;;  %v1426_v61 = vcombine.low %v975_v50, %v975_v50 }
 0x22a   : > { %v898_v54 = vcombine.high %v2725_v48, %v2725_v48  ;;  %v2738_v55 = vrot.slane %v2725_v48, %v2575_v5  ;;  %2191 = vrot.lane.b32.xlu1 %v2190_v49, %s2439_s9  ;;  %v2745_v58 = vcombine.low %v2729_v52, %v878_v45  ;;  %v2748_v59 = vcombine.high %v2729_v52, %v878_v45 }
 0x22b   : > { %v2755_v63 = vrot.slane %v977_v56, %v2575_v5  ;;  %v1433_v3 = vrot.slane %v1426_v61, %v2575_v5  ;;  %v2185_v6 = vpack.i.bf16 %v2723_v47, %v1417_v60  ;;  %v985_v12 = vrot.slane %v2729_v52, %v2575_v5 }
 0x22c   : > { %v2752_v62 = vrot.slane %v898_v54, %v2575_v5  ;;  %v2759_v0 = vcombine.high %v2738_v55, %v2738_v55  ;;  %v1072_v1 = vcombine.low %v2738_v55, %v2738_v55  ;;  %v1047_v13 = vrot.slane %v2678_v16, %v2575_v5 }
 0x22d   : > { %2181 = vrot.lane.b32.xlu0 %v2180_v53, %s2440_s12  ;;  %v2205_v2 = vpack.i.bf16 %v2755_v63, %v2742_v57  ;;  %v925_v14 = vcombine.low %v2669_v10, %v2671_v11  ;;  %v2215_v15 = vpack.i.bf16 %v2755_v63, %v1433_v3  ;;  %v926_v18 = vcombine.high %v2669_v10, %v2671_v11 }
 0x22e   : > { %v2769_v4 = vcombine.high %v2752_v62, %v2752_v62  ;;  %v1079_v7 = vrot.slane %v1072_v1, %v2575_v5  ;;  %v2775_v8 = vrot.slane %v2759_v0, %v2575_v5  ;;  %v1095_v9 = vcombine.low %v2752_v62, %v2752_v62 }
 0x22f   : > { %2206 = vrot.lane.b32.xlu1 %v2205_v2, %s2440_s12  ;;  %v1143_v24 = vcombine.low %v2711_v39, %v2711_v39  ;;  %v993_v26 = vcombine.high %v985_v12, %v985_v12  ;;  %v933_v27 = vrot.slane %v925_v14, %v2575_v5  ;;  %v1150_v28 = vrot.slane %v2692_v25, %v2575_v5 }
 0x230   : > { %v1102_v21 = vrot.slane %v1095_v9, %v2575_v5  ;;  %v2791_v22 = vrot.slane %v2769_v4, %v2575_v5  ;;  %v2195_v23 = vpack.i.bf16 %v2775_v8, %v1079_v7  ;;  %v940_v29 = vrot.slane %v926_v18, %v2575_v5 }
 0x231   : > { %2186 = vrot.lane.b32.xlu0 %v2185_v6, %s2441_s14  ;;  %v1135_v30 = vcombine.low %v1047_v13, %v1047_v13  ;;  %v2000_v10 = vcombine.high %v933_v27, %v933_v27  ;;  %v1159_v31 = vcombine.low %v2716_v42, %v2716_v42  ;;  %v978_v34 = vcombine.high %v2729_v52, %v2729_v52 }
 0x232   : > { %v2230_v11 = vpack.i.bf16 %v2791_v22, %v1102_v21  ;;  %v2001_v32 = vcombine.high %v940_v29, %v940_v29  ;;  %v2810_v36 = vrot.slane %v993_v26, %v2575_v5  ;;  %v1442_v38 = vcombine.low %v985_v12, %v985_v12 }
 0x233   : > { %2216 = vrot.lane.b32.xlu1 %v2215_v15, %s2441_s14  ;;  %v2200_v35 = vpack.i.bf16 %v1143_v24, %v1135_v30  ;;  %v1225_v37 = vrot.slane %v2000_v10, %v2575_v5  ;;  %v1151_v39 = vcombine.low %v1150_v28, %v1150_v28  ;;  %v2817_v40 = vrot.slane %v985_v12, %v2575_v5 }
 0x234   : > { %v1243_v44 = vrot.slane %v2001_v32, %v2575_v5  ;;  %v992_v45 = vrot.slane %v978_v34, %v2575_v5  ;;  %v1449_v49 = vrot.slane %v1442_v38, %v2575_v5  ;;  %v1499_v56 = vcombine.low %v2723_v47, %v2723_v47 }
 0x235   : > { %2196 = vrot.lane.b32.xlu0 %v2195_v23, %s2439_s9  ;;  %v2235_v41 = vpack.i.bf16 %v1159_v31, %v1151_v39  ;;  %v1226_v42 = vcombine.low %v1225_v37, %v1225_v37  ;;  %v2210_v46 = vpack.i.bf16 %v2810_v36, %v2817_v40  ;;  %v1209_v60 = vcombine.low %v933_v27, %v933_v27 }
 0x236   : > { %v1244_v51 = vcombine.low %v1243_v44, %v1243_v44  ;;  %v994_v53 = vcombine.high %v992_v45, %v992_v45  ;;  %v2220_v54 = vpack.i.bf16 %v2810_v36, %v1449_v49  ;;  %v1498_v61 = vcombine.low %v2719_v43, %v2719_v43 }
 0x237   : > { %2231 = vrot.lane.b32.xlu1 %v2230_v11, %s2439_s9  ;;  %v2250_v50 = vpack.i.bf16 %v1225_v37, %v1226_v42  ;;  %v1086_v1 = vrot.slane %v2738_v55, %v2575_v5  ;;  %v943_v2 = vcombine.low %v2725_v48, %v2729_v52  ;;  %v944_v3 = vcombine.high %v2725_v48, %v2729_v52 }
 0x238   : > { %v1005_v47 = vrot.slane %v2681_v17, %v2575_v5  ;;  %v2260_v6 = vpack.i.bf16 %v1243_v44, %v1244_v51  ;;  %v2842_v7 = vrot.slane %v994_v53, %v2575_v5  ;;  %v1458_v9 = vcombine.low %v992_v45, %v992_v45 }
 0x239   : > { %2201 = vrot.lane.b32.xlu0 %v2200_v35, %s2442_s17  ;;  %v2225_v12 = vpack.i.bf16 %v1499_v56, %v1498_v61  ;;  %v1168_v43 = vcombine.low %v2775_v8, %v2775_v8  ;;  %v1216_v13 = vrot.slane %v1209_v60, %v2575_v5  ;;  %v1227_v14 = vcombine.low %v940_v29, %v940_v29 }
 0x23a   : > { %v2849_v15 = vrot.slane %v992_v45, %v2575_v5  ;;  %v1160_v17 = vcombine.low %v1086_v1, %v1086_v1  ;;  %v1012_v48 = vrot.slane %v2684_v19, %v2575_v5  ;;  %v1465_v8 = vrot.slane %v1458_v9, %v2575_v5 }
 0x23b   : > { %2236 = vrot.lane.b32.xlu1 %v2235_v41, %s2442_s17  ;;  %v2008_v21 = vcombine.high %v1005_v47, %v1005_v47  ;;  %v1217_v23 = vcombine.low %v1216_v13, %v1216_v13  ;;  %v1234_v24 = vrot.slane %v1227_v14, %v2575_v5  ;;  %v1501_v27 = vcombine.low %v2755_v63, %v2755_v63 }
 0x23c   : > { %v2265_v52 = vpack.i.bf16 %v2842_v7, %v2849_v15  ;;  %v2240_v18 = vpack.i.bf16 %v1168_v43, %v1160_v17  ;;  %v2270_v26 = vpack.i.bf16 %v2842_v7, %v1465_v8  ;;  %v2009_v28 = vcombine.high %v1012_v48, %v1012_v48 }
 0x23d   : > { %2211 = vrot.lane.b32.xlu0 %v2210_v46, %s2440_s12  ;;  %v1546_v19 = vrot.slane %v2008_v21, %v2575_v5  ;;  %v2245_v29 = vpack.i.bf16 %v1216_v13, %v1217_v23  ;;  %v1235_v30 = vcombine.low %v1234_v24, %v1234_v24  ;;  %v1530_v10 = vcombine.low %v1005_v47, %v1005_v47 }
 0x23e   : > { %v1500_v11 = vcombine.low %v2742_v57, %v2742_v57  ;;  %v1564_v34 = vrot.slane %v2009_v28, %v2575_v5  ;;  %v951_v35 = vrot.slane %v943_v2, %v2575_v5  ;;  %v1503_v37 = vcombine.low %v2810_v36, %v2810_v36 }
 0x23f   : > { %2251 = vrot.lane.b32.xlu1 %v2250_v50, %s2443_s19  ;;  %v1547_v32 = vcombine.low %v1546_v19, %v1546_v19  ;;  %v2255_v63 = vpack.i.bf16 %v1234_v24, %v1235_v30  ;;  %v1537_v38 = vrot.slane %v1530_v10, %v2575_v5  ;;  %v1548_v39 = vcombine.low %v1012_v48, %v1012_v48 }
 0x240   : > { %v2275_v31 = vpack.i.bf16 %v1501_v27, %v1500_v11  ;;  %v1502_v57 = vcombine.low %v2817_v40, %v2817_v40  ;;  %v1565_v42 = vcombine.low %v1564_v34, %v1564_v34  ;;  %v2002_v44 = vcombine.high %v951_v35, %v951_v35 }
 0x241   : > { %2221 = vrot.lane.b32.xlu0 %v2220_v54, %s2441_s14  ;;  %v2290_v41 = vpack.i.bf16 %v1546_v19, %v1547_v32  ;;  %v958_v45 = vrot.slane %v944_v3, %v2575_v5  ;;  %v1538_v49 = vcombine.low %v1537_v38, %v1537_v38  ;;  %v1555_v50 = vrot.slane %v1548_v39, %v2575_v5 }
 0x242   : > { %v2280_v46 = vpack.i.bf16 %v1503_v37, %v1502_v57  ;;  %v1245_v36 = vcombine.low %v951_v35, %v951_v35  ;;  %v1175_v51 = vrot.slane %v2752_v62, %v2575_v5  ;;  %v1023_v53 = vrot.slane %v2745_v58, %v2575_v5 }
 0x243   : > { %2261 = vrot.lane.b32.xlu1 %v2260_v6, %s2443_s19  ;;  %v2300_v40 = vpack.i.bf16 %v1564_v34, %v1565_v42  ;;  %v1184_v54 = vcombine.low %v2791_v22, %v2791_v22  ;;  %v1261_v56 = vrot.slane %v2002_v44, %v2575_v5  ;;  %v2003_v60 = vcombine.high %v958_v45, %v958_v45 }
 0x244   : > { %v2285_v61 = vpack.i.bf16 %v1537_v38, %v1538_v49  ;;  %v1556_v1 = vcombine.low %v1555_v50, %v1555_v50  ;;  %v1252_v2 = vrot.slane %v1245_v36, %v2575_v5  ;;  %v1263_v3 = vcombine.low %v958_v45, %v958_v45 }
 0x245   : > { %2226 = vrot.lane.b32.xlu0 %v2225_v12, %s2444_s18  ;;  %v1176_v47 = vcombine.low %v1175_v51, %v1175_v51  ;;  %v1030_v58 = vrot.slane %v2748_v59, %v2575_v5  ;;  %v1262_v9 = vcombine.low %v1261_v56, %v1261_v56  ;;  %v1279_v22 = vrot.slane %v2003_v60, %v2575_v5 }
 0x246   : > { %v2295_v12 = vpack.i.bf16 %v1555_v50, %v1556_v1  ;;  %v1253_v43 = vcombine.low %v1252_v2, %v1252_v2  ;;  %v1270_v13 = vrot.slane %v1263_v3, %v2575_v5  ;;  %v1566_v14 = vcombine.low %v1023_v53, %v1023_v53 }
 0x247   : > { %2266 = vrot.lane.b32.xlu1 %v2265_v52, %s2440_s12  ;;  %v2305_v6 = vpack.i.bf16 %v1184_v54, %v1176_v47  ;;  %v2315_v17 = vpack.i.bf16 %v1261_v56, %v1262_v9  ;;  %v1280_v48 = vcombine.low %v1279_v22, %v1279_v22  ;;  %v2010_v52 = vcombine.high %v1023_v53, %v1023_v53 }
 0x248   : > { %v2310_v8 = vpack.i.bf16 %v1252_v2, %v1253_v43  ;;  %v1271_v21 = vcombine.low %v1270_v13, %v1270_v13  ;;  %v1573_v59 = vrot.slane %v1566_v14, %v2575_v5  ;;  %v1505_v24 = vcombine.low %v2842_v7, %v2842_v7 }
 0x249   : > { %2241 = vrot.lane.b32.xlu0 %v2240_v18, %s2442_s17  ;;  %v1584_v18 = vcombine.low %v1030_v58, %v1030_v58  ;;  %v2325_v23 = vpack.i.bf16 %v1279_v22, %v1280_v48  ;;  %v2011_v27 = vcombine.high %v1030_v58, %v1030_v58  ;;  %v1504_v30 = vcombine.low %v2849_v15, %v2849_v15 }
 0x24a   : > { %v2320_v19 = vpack.i.bf16 %v1270_v13, %v1271_v21  ;;  %v1574_v28 = vcombine.low %v1573_v59, %v1573_v59 }
 0x24b   : > { %2271 = vrot.lane.b32.xlu1 %v2270_v26, %s2441_s14  ;;  %v1582_v26 = vrot.slane %v2010_v52, %v2575_v5  ;;  %v2330_v10 = vpack.i.bf16 %v1505_v24, %v1504_v30 }
 0x24c   : > { %v2335_v32 = vpack.i.bf16 %v1573_v59, %v1574_v28 }
 0x24d   : > { %2246 = vrot.lane.b32.xlu0 %v2245_v29, %s2443_s19  ;;  %v1591_v29 = vrot.slane %v1584_v18, %v2575_v5  ;;  %v1583_v11 = vcombine.low %v1582_v26, %v1582_v26 }
 0x24f   : > { %2276 = vrot.lane.b32.xlu1 %v2275_v31, %s2444_s18  ;;  %v1600_v31 = vrot.slane %v2011_v27, %v2575_v5  ;;  %v1592_v7 = vcombine.low %v1591_v29, %v1591_v29  ;;  %v2340_v34 = vpack.i.bf16 %v1582_v26, %v1583_v11 }
 0x251   : > { %2256 = vrot.lane.b32.xlu0 %v2255_v63, %s2443_s19  ;;  %v1601_v35 = vcombine.low %v1600_v31, %v1600_v31  ;;  %v2345_v63 = vpack.i.bf16 %v1591_v29, %v1592_v7 }
 0x253   : > { %2291 = vrot.lane.b32.xlu1 %v2290_v41, %s2445_s30  ;;  %v2350_v15 = vpack.i.bf16 %v1600_v31, %v1601_v35 }
 0x255   : > { %2281 = vrot.lane.b32.xlu0 %v2280_v46, %s2444_s18 }
 0x257   : > { %2301 = vrot.lane.b32.xlu1 %v2300_v40, %s2445_s30 }
 0x259   : > { %2286 = vrot.lane.b32.xlu0 %v2285_v61, %s2445_s30 }
 0x25b   : > { %2306 = vrot.lane.b32.xlu1 %v2305_v6, %s2442_s17 }
 0x25d   : > { %2296 = vrot.lane.b32.xlu0 %v2295_v12, %s2445_s30 }
 0x25f   : > { %2316 = vrot.lane.b32.xlu1 %v2315_v17, %s2443_s19 }
 0x261   : > { %2311 = vrot.lane.b32.xlu0 %v2310_v8, %s2443_s19 }
 0x263   : > { %2326 = vrot.lane.b32.xlu1 %v2325_v23, %s2443_s19 }
 0x265   : > { %2321 = vrot.lane.b32.xlu0 %v2320_v19, %s2443_s19 }
 0x267   : > { %2331 = vrot.lane.b32.xlu1 %v2330_v10, %s2444_s18 }
 0x269   : > { %2336 = vrot.lane.b32.xlu0 %v2335_v32, %s2445_s30 }
 0x26b   : > { %2341 = vrot.lane.b32.xlu1 %v2340_v34, %s2445_s30 }
 0x26d   : > { %2346 = vrot.lane.b32.xlu0 %v2345_v63, %s2445_s30 }
 0x26f   : > { %2351 = vrot.lane.b32.xlu1 %v2350_v15, %s2445_s30 }
 0x29b   : > { %v2177_v37 = vpop.permute.xlu0 %2176 }
 0x29c   : > { %v2192_v38 = vpop.permute.xlu1 %2191  ;;  %v2179_v50 = vunpack.i.h.bf16 %v2177_v37  ;;  %v2178_v52 = vunpack.i.l.bf16 %v2177_v37 }
 0x29d   : > { %v2194_v60 = vunpack.i.h.bf16 %v2192_v38  ;;  %v2193_v24 = vunpack.i.l.bf16 %v2192_v38 }
 0x29e   : > { %v1653_v56 = vsel %vm1651_vm12, %v2698_v20, %v2179_v50  ;;  %v1652_v23 = vsel %vm1651_vm12, %v2678_v16, %v2178_v52 }
 0x29f   : > { %v2914_v39 = vpop.permute.xlu0 %2181  ;;  %v1655_v12 = vsel %vm1651_vm12, %v2704_v33, %v2194_v60  ;;  %v1654_v16 = vsel %vm1651_vm12, %v2692_v25, %v2193_v24 }
 0x2a0   : > { %v2184_v34 = vunpack.i.h.bf16 %v2914_v39  ;;  %v2183_v60 = vunpack.i.l.bf16 %v2914_v39 }
 0x2a1   : > { %v2916_v5 = vpop.permute.xlu1 %2206 }
 0x2a3   : > { %v2918_v57 = vpop.permute.xlu0 %2186 }
 0x2a4   : > { %v2189_v10 = vunpack.i.h.bf16 %v2918_v57  ;;  %v2188_v25 = vunpack.i.l.bf16 %v2918_v57 }
 0x2a5   : > { %v2920_v41 = vpop.permute.xlu1 %2216 }
 0x2a6   : > { %v1678_v50 = vsel %vm1651_vm12, %v2184_v34, %v2189_v10 }
 0x2a7   : > { %v2922_v42 = vpop.permute.xlu0 %2196 }
 0x2a9   : > { %v2924_v44 = vpop.permute.xlu1 %2231 }
 0x2ab   : > { %v2202_v45 = vpop.permute.xlu0 %2201 }
 0x2ac   : > { %v2204_v36 = vunpack.i.h.bf16 %v2202_v45  ;;  %v2203_v33 = vunpack.i.l.bf16 %v2202_v45 }
 0x2ad   : > { %v2237_v46 = vpop.permute.xlu1 %2236 }
 0x2ae   : > { %v1662_v61 = vsel %vm1660_vm13, %v1653_v56, %v2204_v36  ;;  %v2239_v1 = vunpack.i.h.bf16 %v2237_v46  ;;  %v1661_v26 = vsel %vm1660_vm13, %v1652_v23, %v2203_v33  ;;  %v2238_v27 = vunpack.i.l.bf16 %v2237_v46 }
 0x2af   : > { %v2926_v49 = vpop.permute.xlu0 %2211  ;;  %v2219_v36 = vunpack.i.h.bf16 %v2920_v41  ;;  %v2198_v23 = vunpack.i.l.bf16 %v2922_v42 }
 0x2b0   : > { %v1664_v20 = vsel %vm1660_vm13, %v1655_v12, %v2239_v1  ;;  %v1663_v35 = vsel %vm1660_vm13, %v1654_v16, %v2238_v27 }
 0x2b1   : > { %v2252_v51 = vpop.permute.xlu1 %2251 }
 0x2b2   : > { %v2254_v53 = vunpack.i.h.bf16 %v2252_v51  ;;  %v2253_v40 = vunpack.i.l.bf16 %v2252_v51 }
 0x2b3   : > { %v2930_v54 = vpop.permute.xlu0 %2221 }
 0x2b4   : > { %v1315_v2 = vsel %vm1313_vm14, %v2253_v40, %v2254_v53 }
 0x2b5   : > { %v1670_v3 = vsel %vm640_vm8, %v1662_v61, %v1315_v2  ;;  %v2262_v47 = vpop.permute.xlu1 %2261  ;;  %v2209_v61 = vunpack.i.h.bf16 %v2916_v5 }
 0x2b6   : > { %v2036_v58 = vpack.c.bf16 %v1670_v3, %v1670_v3  ;;  %v2264_v6 = vunpack.i.h.bf16 %v2262_v47  ;;  %v2263_v9 = vunpack.i.l.bf16 %v2262_v47 }
 0x2b7   : > { %v2937_v22 = vpop.permute.xlu0 %2226  ;;  %v1680_v12 = vsel %vm1651_vm12, %v2209_v61, %v2219_v36 }
 0x2b8   : > { %1768 = vst.msk [vmem:[%s2942_s20 + $0x8] sm:$0xf] %vm1765_vm15, %v2036_v58  ;;  %v1317_v43 = vsel %vm1313_vm14, %v2263_v9, %v2264_v6  ;;  %v2229_v7 = vunpack.i.h.bf16 %v2937_v22  ;;  %v2228_v1 = vunpack.i.l.bf16 %v2937_v22  ;;  %v1677_v9 = vsel %vm1651_vm12, %v2183_v60, %v2188_v25 }
 0x2b9   : > { %v1672_v13 = vsel %vm640_vm8, %v1664_v20, %v1317_v43  ;;  %v2948_v14 = vpop.permute.xlu1 %2266  ;;  %v2218_v43 = vunpack.i.l.bf16 %v2920_v41  ;;  %v2208_v41 = vunpack.i.l.bf16 %v2916_v5 }
 0x2ba   : > { %v2040_v17 = vpack.c.bf16 %v1672_v13, %v1672_v13  ;;  %v1686_v53 = vsel %vm1660_vm13, %v1678_v50, %v2229_v7  ;;  %v2199_v13 = vunpack.i.h.bf16 %v2922_v42  ;;  %v1685_v52 = vsel %vm1660_vm13, %v1677_v9, %v2228_v1 }
 0x2bb   : > { %v2950_v48 = vpop.permute.xlu0 %2241  ;;  %v1679_v10 = vsel %vm1651_vm12, %v2208_v41, %v2218_v43  ;;  %v1656_v7 = vsel %vm1651_vm12, %v2738_v55, %v2198_v23 }
 0x2bc   : > { %1772 = vst.msk [vmem:[%s2942_s20 + $0x18] sm:$0xf] %vm1765_vm15, %v2040_v17  ;;  %v1657_v5 = vsel %vm1651_vm12, %v2759_v0, %v2199_v13  ;;  %v2243_v42 = vunpack.i.l.bf16 %v2950_v48  ;;  %v2233_v0 = vunpack.i.l.bf16 %v2924_v44 }
 0x2bd   : > { %v2954_v8 = vpop.permute.xlu1 %2271 }
 0x2be   : > { %v1665_v55 = vsel %vm1660_vm13, %v1656_v7, %v2243_v42  ;;  %v2273_v23 = vunpack.i.l.bf16 %v2954_v8 }
 0x2bf   : > { %v2247_v21 = vpop.permute.xlu0 %2246 }
 0x2c0   : > { %v2249_v59 = vunpack.i.h.bf16 %v2247_v21  ;;  %v2248_v18 = vunpack.i.l.bf16 %v2247_v21 }
 0x2c1   : > { %v2960_v28 = vpop.permute.xlu1 %2276 }
 0x2c2   : > { %v1314_v19 = vsel %vm1313_vm14, %v2248_v18, %v2249_v59  ;;  %v2279_v40 = vunpack.i.h.bf16 %v2960_v28  ;;  %v2278_v33 = vunpack.i.l.bf16 %v2960_v28  ;;  %v2234_v28 = vunpack.i.h.bf16 %v2924_v44 }
 0x2c3   : > { %v1669_v29 = vsel %vm640_vm8, %v1661_v26, %v1314_v19  ;;  %v2257_v30 = vpop.permute.xlu0 %2256 }
 0x2c4   : > { %v2034_v11 = vpack.c.bf16 %v1669_v29, %v1669_v29  ;;  %v2259_v31 = vunpack.i.h.bf16 %v2257_v30  ;;  %v2258_v32 = vunpack.i.l.bf16 %v2257_v30  ;;  %v1688_v22 = vsel %vm1660_vm13, %v1680_v12, %v2279_v40 }
 0x2c5   : > { %v2292_v15 = vpop.permute.xlu1 %2291 }
 0x2c6   : > { %1766 = vst.msk [vmem:[%s2942_s20] sm:$0xf] %vm1765_vm15, %v2034_v11  ;;  %v1316_v63 = vsel %vm1313_vm14, %v2258_v32, %v2259_v31  ;;  %v2294_v38 = vunpack.i.h.bf16 %v2292_v15  ;;  %v2293_v45 = vunpack.i.l.bf16 %v2292_v15  ;;  %v2244_v11 = vunpack.i.h.bf16 %v2950_v48 }
 0x2c7   : > { %v1671_v37 = vsel %vm640_vm8, %v1663_v35, %v1316_v63  ;;  %v2973_v46 = vpop.permute.xlu0 %2281  ;;  %v1687_v31 = vsel %vm1660_vm13, %v1679_v10, %v2278_v33  ;;  %v2214_v33 = vunpack.i.h.bf16 %v2926_v49 }
 0x2c8   : > { %v2038_v51 = vpack.c.bf16 %v1671_v37, %v1671_v37  ;;  %v1636_v56 = vsel %vm1634_vm0, %v2293_v45, %v2294_v38  ;;  %v1659_v45 = vsel %vm1651_vm12, %v2769_v4, %v2234_v28  ;;  %v1666_v25 = vsel %vm1660_vm13, %v1657_v5, %v2244_v11 }
 0x2c9   : > { %v1694_v57 = vsel %vm640_vm8, %v1686_v53, %v1636_v56  ;;  %v2302_v2 = vpop.permute.xlu1 %2301  ;;  %v2274_v5 = vunpack.i.h.bf16 %v2954_v8 }
 0x2ca   : > { %1770 = vst.msk [vmem:[%s2942_s20 + $0x10] sm:$0xf] %vm1765_vm15, %v2038_v51  ;;  %v2037_v3 = vpack.c.bf16 %v1694_v57, %v1694_v57  ;;  %v2304_v47 = vunpack.i.h.bf16 %v2302_v2  ;;  %v2303_v58 = vunpack.i.l.bf16 %v2302_v2  ;;  %v1658_v57 = vsel %vm1651_vm12, %v2752_v62, %v2233_v0 }
 0x2cb   : > { %v2287_v6 = vpop.permute.xlu0 %2286 }
 0x2cc   : > { %v2289_v20 = vunpack.i.h.bf16 %v2287_v6  ;;  %v2288_v39 = vunpack.i.l.bf16 %v2287_v6  ;;  %1769 = vst.msk [vmem:[%s2942_s20 + $0xc] sm:$0xf] %vm1765_vm15, %v2037_v3  ;;  %v1638_v17 = vsel %vm1634_vm0, %v2303_v58, %v2304_v47  ;;  %v2224_v58 = vunpack.i.h.bf16 %v2930_v54 }
 0x2cd   : > { %v1696_v21 = vsel %vm640_vm8, %v1688_v22, %v1638_v17  ;;  %v2307_v18 = vpop.permute.xlu1 %2306  ;;  %v2223_v6 = vunpack.i.l.bf16 %v2930_v54  ;;  %v2213_v54 = vunpack.i.l.bf16 %v2926_v49 }
 0x2ce   : > { %v1635_v59 = vsel %vm1634_vm0, %v2288_v39, %v2289_v20  ;;  %v2041_v24 = vpack.c.bf16 %v1696_v21, %v1696_v21  ;;  %v2309_v50 = vunpack.i.h.bf16 %v2307_v18  ;;  %v2308_v51 = vunpack.i.l.bf16 %v2307_v18 }
 0x2cf   : > { %v1693_v26 = vsel %vm640_vm8, %v1685_v52, %v1635_v59  ;;  %v2297_v27 = vpop.permute.xlu0 %2296  ;;  %v2283_v20 = vunpack.i.l.bf16 %v2973_v46  ;;  %v1681_v41 = vsel %vm1651_vm12, %v2213_v54, %v2223_v6 }
 0x2d0   : > { %v2035_v19 = vpack.c.bf16 %v1693_v26, %v1693_v26  ;;  %v2299_v29 = vunpack.i.h.bf16 %v2297_v27  ;;  %v2298_v30 = vunpack.i.l.bf16 %v2297_v27  ;;  %1773 = vst.msk [vmem:[%s2942_s20 + $0x1c] sm:$0xf] %vm1765_vm15, %v2041_v24  ;;  %v1668_v9 = vsel %vm1660_vm13, %v1659_v45, %v2309_v50 }
 0x2d1   : > { %v2317_v16 = vpop.permute.xlu1 %2316  ;;  %v1667_v39 = vsel %vm1660_vm13, %v1658_v57, %v2308_v51  ;;  %v2284_v24 = vunpack.i.h.bf16 %v2973_v46  ;;  %v1682_v26 = vsel %vm1651_vm12, %v2214_v33, %v2224_v58  ;;  %v1689_v27 = vsel %vm1660_vm13, %v1681_v41, %v2283_v20 }
 0x2d2   : > { %1767 = vst.msk [vmem:[%s2942_s20 + $0x4] sm:$0xf] %vm1765_vm15, %v2035_v19  ;;  %v1637_v32 = vsel %vm1634_vm0, %v2298_v30, %v2299_v29  ;;  %v2319_v35 = vunpack.i.h.bf16 %v2317_v16  ;;  %v2318_v63 = vunpack.i.l.bf16 %v2317_v16  ;;  %v2268_v30 = vunpack.i.l.bf16 %v2948_v14 }
 0x2d3   : > { %v1695_v34 = vsel %vm640_vm8, %v1687_v31, %v1637_v32  ;;  %v2312_v15 = vpop.permute.xlu0 %2311  ;;  %v1690_v7 = vsel %vm1660_vm13, %v1682_v26, %v2284_v24 }
 0x2d4   : > { %v2039_v37 = vpack.c.bf16 %v1695_v34, %v1695_v34  ;;  %v2314_v48 = vunpack.i.h.bf16 %v2312_v15  ;;  %v2313_v38 = vunpack.i.l.bf16 %v2312_v15  ;;  %v1319_v36 = vsel %vm1313_vm14, %v2318_v63, %v2319_v35 }
 0x2d5   : > { %v1674_v53 = vsel %vm640_vm8, %v1666_v25, %v1319_v36  ;;  %v2327_v40 = vpop.permute.xlu1 %2326  ;;  %v1683_v16 = vsel %vm1651_vm12, %v2268_v30, %v2273_v23  ;;  %v2269_v63 = vunpack.i.h.bf16 %v2948_v14 }
 0x2d6   : > { %1771 = vst.msk [vmem:[%s2942_s20 + $0x14] sm:$0xf] %vm1765_vm15, %v2039_v37  ;;  %v1318_v44 = vsel %vm1313_vm14, %v2313_v38, %v2314_v48  ;;  %v2044_v56 = vpack.c.bf16 %v1674_v53, %v1674_v53  ;;  %v2329_v60 = vunpack.i.h.bf16 %v2327_v40  ;;  %v2328_v61 = vunpack.i.l.bf16 %v2327_v40 }
 0x2d7   : > { %v1673_v4 = vsel %vm640_vm8, %v1665_v55, %v1318_v44  ;;  %v2322_v1 = vpop.permute.xlu0 %2321  ;;  %v1684_v50 = vsel %vm1651_vm12, %v2269_v63, %v2274_v5 }
 0x2d8   : > { %v2042_v2 = vpack.c.bf16 %v1673_v4, %v1673_v4  ;;  %v2324_v3 = vunpack.i.h.bf16 %v2322_v1  ;;  %v2323_v47 = vunpack.i.l.bf16 %v2322_v1  ;;  %1776 = vst.msk [vmem:[%s2942_s20 + $0x28] sm:$0xf] %vm1765_vm15, %v2044_v56  ;;  %v1321_v12 = vsel %vm1313_vm14, %v2328_v61, %v2329_v60 }
 0x2d9   : > { %v1676_v62 = vsel %vm640_vm8, %v1668_v9, %v1321_v12  ;;  %v2332_v13 = vpop.permute.xlu1 %2331 }
 0x2da   : > { %1774 = vst.msk [vmem:[%s2942_s20 + $0x20] sm:$0xf] %vm1765_vm15, %v2042_v2  ;;  %v1320_v43 = vsel %vm1313_vm14, %v2323_v47, %v2324_v3  ;;  %v2048_v22 = vpack.c.bf16 %v1676_v62, %v1676_v62  ;;  %v2333_v19 = vunpack.i.l.bf16 %v2332_v13  ;;  %v2334_v34 = vunpack.i.h.bf16 %v2332_v13 }
 0x2db   : > { %v1675_v17 = vsel %vm640_vm8, %v1667_v39, %v1320_v43  ;;  %v2337_v52 = vpop.permute.xlu0 %2336 }
 0x2dc   : > { %v2046_v21 = vpack.c.bf16 %v1675_v17, %v1675_v17  ;;  %v2339_v59 = vunpack.i.h.bf16 %v2337_v52  ;;  %v2338_v18 = vunpack.i.l.bf16 %v2337_v52  ;;  %1780 = vst.msk [vmem:[%s2942_s20 + $0x38] sm:$0xf] %vm1765_vm15, %v2048_v22  ;;  %v1691_v15 = vsel %vm1660_vm13, %v1683_v16, %v2333_v19 }
 0x2dd   : > { %v2342_v29 = vpop.permute.xlu1 %2341  ;;  %v1692_v14 = vsel %vm1660_vm13, %v1684_v50, %v2334_v34 }
 0x2de   : > { %1778 = vst.msk [vmem:[%s2942_s20 + $0x30] sm:$0xf] %vm1765_vm15, %v2046_v21  ;;  %v1639_v49 = vsel %vm1634_vm0, %v2338_v18, %v2339_v59  ;;  %v2344_v28 = vunpack.i.h.bf16 %v2342_v29  ;;  %v2343_v11 = vunpack.i.l.bf16 %v2342_v29 }
 0x2df   : > { %v1697_v10 = vsel %vm640_vm8, %v1689_v27, %v1639_v49  ;;  %v2347_v46 = vpop.permute.xlu0 %2346 }
 0x2e0   : > { %v2043_v42 = vpack.c.bf16 %v1697_v10, %v1697_v10  ;;  %v2349_v31 = vunpack.i.h.bf16 %v2347_v46  ;;  %v2348_v32 = vunpack.i.l.bf16 %v2347_v46  ;;  %v1640_v35 = vsel %vm1634_vm0, %v2343_v11, %v2344_v28 }
 0x2e1   : > { %v1698_v8 = vsel %vm640_vm8, %v1690_v7, %v1640_v35  ;;  %v2352_v37 = vpop.permute.xlu1 %2351 }
 0x2e2   : > { %1775 = vst.msk [vmem:[%s2942_s20 + $0x24] sm:$0xf] %vm1765_vm15, %v2043_v42  ;;  %v1641_v0 = vsel %vm1634_vm0, %v2348_v32, %v2349_v31  ;;  %v2045_v48 = vpack.c.bf16 %v1698_v8, %v1698_v8  ;;  %v2354_v45 = vunpack.i.h.bf16 %v2352_v37  ;;  %v2353_v25 = vunpack.i.l.bf16 %v2352_v37 }
 0x2e3   : > { %v1699_v38 = vsel %vm640_vm8, %v1691_v15, %v1641_v0 }
 0x2e4   : > { %v2047_v36 = vpack.c.bf16 %v1699_v38, %v1699_v38  ;;  %1777 = vst.msk [vmem:[%s2942_s20 + $0x2c] sm:$0xf] %vm1765_vm15, %v2045_v48  ;;  %v1642_v55 = vsel %vm1634_vm0, %v2353_v25, %v2354_v45 }
 0x2e5   : > { %v1700_v51 = vsel %vm640_vm8, %v1692_v14, %v1642_v55 }
 0x2e6   : > { %1779 = vst.msk [vmem:[%s2942_s20 + $0x34] sm:$0xf] %vm1765_vm15, %v2047_v36  ;;  %v2049_v53 = vpack.c.bf16 %v1700_v51, %v1700_v51 }
 0x2e8   : > { %1781 = vst.msk [vmem:[%s2942_s20 + $0x3c] sm:$0xf] %vm1765_vm15, %v2049_v53 }
 0x2e9   : > { %s2029_s9 = sshll.u32 %s2408_s24, 1  ;;  %s2030_s12 = sshll.u32 %s2412_s25, 5 }
 0x2ea   : > { %s1795_s14 = sadd.s32 %s2030_s12, %s2029_s9  ;;  %s1814_s17 = sshll.u32 %s2942_s20, 4  ;;  %s1815_s17 = int_to_ptr.vmem [resolvable:$true] %s1814_s17 }
 0x2eb   : > { %s2031_s19 = sshll.u32 %s1795_s14, 6  ;;  %s2446_s13 = smov 128  }
 0x2ec   : > { %s1797_s16 = scalar_lea.hbm %s3134_s6, %s2031_s19  ;;  %2069 = sst [smem:[#allocation5]] (%p2539_p3), %s2446_s13 }
 0x2ed   : > { %s2447_s0 = smov 256   ;;  %s2448_s1 = smov 2  }
 0x2ee   : > { %2070 = sst [smem:[#allocation5 + $0x1]] (%p2539_p3), %s2447_s0  ;;  %s2449_s24 = smov 64  }
 0x2ef   : > { %2071 = sst [smem:[#allocation5 + $0x2]] (%p2539_p3), %s2448_s1  ;;  %s2450_s25 = smov 4  }
 0x2f0   : > { %2072 = sst [smem:[#allocation5 + $0x3]] (%p2539_p3), %s2449_s24  ;;  %s2451_s20 = smov [#allocation4]  }
 0x2f1   : > { %2073 = sst [smem:[#allocation5 + $0x4]] (%p2539_p3), %s2449_s24  ;;  %s2452_s9 = smov 0  }
 0x2f2   : > { %2074 = sst [smem:[#allocation5 + $0x5]] (%p2539_p3), %s2450_s25 }
 0x2f3   : > { %2075 = dma.general (%p2539_p3), %s1815_s17, 1024, %s1797_s16, %s1783_s29, %s2451_s20, [#allocation5], %s2452_s9, 0  }
 0x2f4 PF: > { %p2081_p2 = scmp.ge.s32.totalorder %s2424_s28, 2  ;;  %s1842_s0 = sand.u32 1, %s2396_s21  }
 0x2f5   : > { %s1843_s1 = scalar_lea.sflag [#allocation3], %s1842_s0 }
 0x2f6   : > { %p2078_p4 = pnand %p2081_p2, %p2548_p8 }
 0x2f8   : > { %2391 = dma.done.wait (!%p2078_p4), %s1843_s1, 1024  }
 0x2f9   : > { %2393 = vsyncadd (!%p2078_p4), %s1843_s1, 4294966272  ;;  %s19_s28 = sadd.s32 1, %s2424_s28   ;;  %s3142_s21 = smov %s2400_s22 }
 0x2fa   : > { %p16_p5 = scmp.ge.s32.totalorder %s19_s28, 6   ;;  %s3143_s22 = smov %s2404_s23 }
 0x2fb   : > { %s3144_s23 = smov %s2557_s15  ;;  %s3145_s24 = smov %s2416_s26 }
 0x2fc   : > { %s3146_s25 = smov %s2420_s27  ;;  %s3147_s26 = smov %s3150_s7 }
 0x2fd   : > { %s3148_s27 = smov %s3154_s8  ;;  %18 = sbr.rel (!%p16_p5) target bundleno = 8 (0x8), region = 97 }
 0x304   :  { %1848 = vsyncpa [#allocation3], 1 }
 0x305   :  { %1850 = vsyncpa [#allocation3 + $0x1], 1 }

</bundles_post_ra>
